<compile_context>
chip_gen: v6e
topology: v6e:2x2x1
jax: 0.10.0
libtpu: 0.0.40
codegen_flags: <defaults>
</compile_context>

<pallas_src>
import functools
import math

import jax
import jax.numpy as jnp
from jax.experimental import pallas as pl
from jax.experimental.pallas import tpu as pltpu


# ----------------------------------------------------------------------------
# Kernel: 3 K-fused matmuls + tanh gates + blend, fully fused.
# ----------------------------------------------------------------------------
def dgm_kernel(x_ref, sp_ref, sf_ref,
               a_zr_ref, a_g_ref, a_h_ref,
               b_zr_ref, b_g_ref, b_h_ref,
               out_ref, *, hidden):
    H = hidden
    cdt = a_zr_ref.dtype                        # MXU compute dtype (bf16)

    # Load f32 activations; cast to the MXU dtype in-kernel (VPU filler).
    s_prev_f32 = sp_ref[...].astype(jnp.float32)   # kept exact for the blend
    x = x_ref[...].astype(cdt)                      # [bt, in_dim]
    sp = s_prev_f32.astype(cdt)                     # [bt, H]
    sf = sf_ref[...].astype(cdt)                    # [bt, H]

    # ---- z, r : one K-fused matmul over [x | s_prev] -> [bt, 2H]
    xs_prev = jnp.concatenate([x, sp], axis=-1)
    zr = jnp.tanh(
        jnp.dot(xs_prev, a_zr_ref[...], preferred_element_type=jnp.float32)
        + b_zr_ref[...])
    z = zr[:, :H]
    r = zr[:, H:]

    # ---- g : K-fused matmul over [x | s_first] -> [bt, H]
    xs_first = jnp.concatenate([x, sf], axis=-1)
    g = jnp.tanh(
        jnp.dot(xs_first, a_g_ref[...], preferred_element_type=jnp.float32)
        + b_g_ref[...])

    # ---- h : K-fused matmul over [x | s_prev*r] -> [bt, H]
    sr = (s_prev_f32 * r).astype(cdt)
    xs_r = jnp.concatenate([x, sr], axis=-1)
    h = jnp.tanh(
        jnp.dot(xs_r, a_h_ref[...], preferred_element_type=jnp.float32)
        + b_h_ref[...])

    # ---- final blend in f32
    s_next = (1.0 - g) * h + z * s_prev_f32
    out_ref[...] = s_next.astype(out_ref.dtype)


# ----------------------------------------------------------------------------
# One-time parameter packing (do this once per model, NOT per time step).
# ----------------------------------------------------------------------------
def pack_params(params, compute_dtype=jnp.bfloat16):
    """params: U_*/W_* already transposed to [in, out] / [hidden, hidden]."""
    A_zr = jnp.concatenate(
        [jnp.concatenate([params["U_z"], params["U_r"]], axis=1),
         jnp.concatenate([params["W_z"], params["W_r"]], axis=1)],
        axis=0).astype(compute_dtype)                       # [in+H, 2H]
    A_g = jnp.concatenate([params["U_g"], params["W_g"]],
                          axis=0).astype(compute_dtype)     # [in+H, H]
    A_h = jnp.concatenate([params["U_h"], params["W_h"]],
                          axis=0).astype(compute_dtype)     # [in+H, H]
    b_zr = jnp.concatenate([params["b_z"], params["b_r"]],
                           axis=1).astype(jnp.float32)      # [1, 2H]
    b_g = params["b_g"].astype(jnp.float32)
    b_h = params["b_h"].astype(jnp.float32)
    return dict(A_zr=A_zr, A_g=A_g, A_h=A_h, b_zr=b_zr, b_g=b_g, b_h=b_h)


# ----------------------------------------------------------------------------
# Batch-tile picker: sublane-aligned divisor, >= 2 grid steps when possible.
# ----------------------------------------------------------------------------
def _pick_batch_tile(B, target=512):
    aligned_divs = [t for t in range(8, B + 1, 8) if B % t == 0]
    if not aligned_divs:
        return B                      # tiny / awkward B: one full-array block
    candidates = [t for t in aligned_divs if t <= target]
    tile = candidates[-1] if candidates else aligned_divs[0]
    if tile == B:                     # give v7x's 2 TensorCores >= 2 steps
        smaller = [t for t in aligned_divs if t < B]
        if smaller:
            tile = smaller[-1]
    return tile


# ----------------------------------------------------------------------------
# Wrapper
# ----------------------------------------------------------------------------
def dgm_block(x, s_prev, s_first, packed, *, batch_tile=None):
    B, in_dim = x.shape
    H = s_prev.shape[1]
    out_dtype = x.dtype

    a_zr, a_g, a_h = packed["A_zr"], packed["A_g"], packed["A_h"]
    b_zr, b_g, b_h = packed["b_zr"], packed["b_g"], packed["b_h"]
    assert a_zr.shape == (in_dim + H, 2 * H)

    if batch_tile is None:
        batch_tile = _pick_batch_tile(B, target=512)
    assert B % batch_tile == 0, "batch_tile must divide the batch size"
    grid = (B // batch_tile,)

    def batch_map(i):        # activations / output follow the batch axis
        return (i, 0)

    def const_map(i):        # weights: same block every step -> VMEM-resident
        return (0, 0)

    in_specs = [
        pl.BlockSpec((batch_tile, in_dim), batch_map),      # x      (f32)
        pl.BlockSpec((batch_tile, H), batch_map),           # s_prev (f32)
        pl.BlockSpec((batch_tile, H), batch_map),           # s_first(f32)
        pl.BlockSpec((in_dim + H, 2 * H), const_map),       # A_zr   (bf16)
        pl.BlockSpec((in_dim + H, H), const_map),           # A_g
        pl.BlockSpec((in_dim + H, H), const_map),           # A_h
        pl.BlockSpec((1, 2 * H), const_map),                # b_zr   (f32)
        pl.BlockSpec((1, H), const_map),                    # b_g
        pl.BlockSpec((1, H), const_map),                    # b_h
    ]
    out_spec = pl.BlockSpec((batch_tile, H), batch_map)

    operands = (x, s_prev, s_first, a_zr, a_g, a_h, b_zr, b_g, b_h)

    # Cost hint for XLA scheduling around the custom call.
    flops = 2 * B * (in_dim + H) * (4 * H)
    bytes_accessed = (sum(int(a.size) * a.dtype.itemsize for a in operands)
                      + B * H * jnp.dtype(out_dtype).itemsize)

    # Explicit VMEM budget: double-buffered blocks + in-kernel intermediates.
    w_bytes = sum(int(a.size) * a.dtype.itemsize
                  for a in (a_zr, a_g, a_h, b_zr, b_g, b_h))
    act_bytes = batch_tile * (in_dim + 2 * H) * 4
    out_bytes = batch_tile * H * jnp.dtype(out_dtype).itemsize
    scratch_bytes = batch_tile * (3 * (in_dim + H) + 10 * H) * 4
    vmem_limit = int(min(64 * 2 ** 20,
                         max(16 * 2 ** 20,
                             3 * (2 * (w_bytes + act_bytes + out_bytes)
                                  + scratch_bytes))))

    return pl.pallas_call(
        functools.partial(dgm_kernel, hidden=H),
        out_shape=jax.ShapeDtypeStruct((B, H), out_dtype),
        grid=grid,
        in_specs=in_specs,
        out_specs=out_spec,
        compiler_params=pltpu.CompilerParams(
            dimension_semantics=("parallel",),
            vmem_limit_bytes=vmem_limit),
        cost_estimate=pl.CostEstimate(
            flops=int(flops),
            transcendentals=int(4 * B * H),
            bytes_accessed=int(bytes_accessed)),
    )(*operands)


# ----------------------------------------------------------------------------
# Deterministic parameter init (xavier_uniform for weights, zeros for biases)
# ----------------------------------------------------------------------------
def xavier_uniform(key, fan_in, fan_out):
    bound = math.sqrt(6.0 / (fan_in + fan_out))
    # produce [in, out] directly (the transposed layout the kernel expects)
    return jax.random.uniform(key, (fan_in, fan_out), jnp.float32,
                              minval=-bound, maxval=bound)


def init_params(key, in_dim, hidden_dim):
    keys = jax.random.split(key, 8)
    p = {}
    for i, n in enumerate(["z", "g", "r", "h"]):
        p[f"U_{n}"] = xavier_uniform(keys[2 * i], in_dim, hidden_dim)
        p[f"W_{n}"] = xavier_uniform(keys[2 * i + 1], hidden_dim, hidden_dim)
        p[f"b_{n}"] = jnp.zeros((1, hidden_dim), jnp.float32)
    return p


# ----------------------------------------------------------------------------
# Plain-JAX reference (mirrors the PyTorch forward; optionally quantizes the
# matmul operands exactly like the kernel does, for a tight tolerance check).
# ----------------------------------------------------------------------------
def dgm_reference(x, s_prev, s_first, p, compute_dtype=None):
    if compute_dtype is None:
        q = lambda a: a.astype(jnp.float32)
    else:
        q = lambda a: a.astype(compute_dtype).astype(jnp.float32)
    z = jnp.tanh(q(x) @ q(p["U_z"]) + p["b_z"] + q(s_prev) @ q(p["W_z"]))
    g = jnp.tanh(q(x) @ q(p["U_g"]) + p["b_g"] + q(s_first) @ q(p["W_g"]))
    r = jnp.tanh(q(x) @ q(p["U_r"]) + p["b_r"] + q(s_prev) @ q(p["W_r"]))
    h = jnp.tanh(q(x) @ q(p["U_h"]) + p["b_h"] + q(s_prev * r) @ q(p["W_h"]))
    return (1.0 - g) * h + z * s_prev


if __name__ == "__main__":
    B, IN_DIM, HIDDEN = 16, 16, 32   # B=16 -> batch_tile=8, grid=(2,)

    key = jax.random.PRNGKey(0)
    k_x, k_sp, k_sf, k_p = jax.random.split(key, 4)

    x = jax.random.normal(k_x, (B, IN_DIM), jnp.float32)
    s_prev = jax.random.normal(k_sp, (B, HIDDEN), jnp.float32)
    s_first = jax.random.normal(k_sf, (B, HIDDEN), jnp.float32)

    params = init_params(k_p, IN_DIM, HIDDEN)
    packed = pack_params(params, compute_dtype=jnp.bfloat16)   # once per model

    s_next = dgm_block(x, s_prev, s_first, packed)
    jax.block_until_ready(s_next)
    assert s_next.shape == (B, HIDDEN)

    # Tight check against a reference that quantizes MXU operands identically.
    ref_q = dgm_reference(x, s_prev, s_first, params,
                          compute_dtype=jnp.bfloat16)
    assert jnp.allclose(s_next, ref_q, atol=2e-3, rtol=2e-3), \
        "mismatch vs bf16-consistent reference"

    print("KERNEL_OK")
</pallas_src>

<mosaic_0001>
module attributes {stable_mosaic.version = 11 : i64} {
  func.func @dgm_kernel(%arg0: i32, %arg1: memref<8x16xf32, #tpu.memory_space<vmem>>, %arg2: memref<8x32xf32, #tpu.memory_space<vmem>>, %arg3: memref<8x32xf32, #tpu.memory_space<vmem>>, %arg4: memref<48x64xbf16, #tpu.memory_space<vmem>>, %arg5: memref<48x32xbf16, #tpu.memory_space<vmem>>, %arg6: memref<48x32xbf16, #tpu.memory_space<vmem>>, %arg7: memref<1x64xf32, #tpu.memory_space<vmem>>, %arg8: memref<1x32xf32, #tpu.memory_space<vmem>>, %arg9: memref<1x32xf32, #tpu.memory_space<vmem>>, %arg10: memref<8x32xf32, #tpu.memory_space<vmem>>) attributes {dimension_semantics = [#tpu.dimension_semantics<parallel>], iteration_bounds = array<i64: 2>, scalar_prefetch = 0 : i64, scratch_operands = 0 : i64, tpu.core_type = #tpu.core_type<tc>, window_params = [{transform_indices = @transform_0, window_bounds = array<i64: 8, 16>}, {transform_indices = @transform_1, window_bounds = array<i64: 8, 32>}, {transform_indices = @transform_2, window_bounds = array<i64: 8, 32>}, {pipeline_mode = #tpu.pipeline_mode<synchronous>, transform_indices = @transform_3, window_bounds = array<i64: 48, 64>}, {pipeline_mode = #tpu.pipeline_mode<synchronous>, transform_indices = @transform_4, window_bounds = array<i64: 48, 32>}, {pipeline_mode = #tpu.pipeline_mode<synchronous>, transform_indices = @transform_5, window_bounds = array<i64: 48, 32>}, {pipeline_mode = #tpu.pipeline_mode<synchronous>, transform_indices = @transform_6, window_bounds = array<i64: 1, 64>}, {pipeline_mode = #tpu.pipeline_mode<synchronous>, transform_indices = @transform_7, window_bounds = array<i64: 1, 32>}, {pipeline_mode = #tpu.pipeline_mode<synchronous>, transform_indices = @transform_8, window_bounds = array<i64: 1, 32>}, {transform_indices = @transform_9, window_bounds = array<i64: 8, 32>}]} {
    %c0 = arith.constant 0 : index
    %c0_0 = arith.constant 0 : index
    %0 = vector.load %arg2[%c0, %c0_0] : memref<8x32xf32, #tpu.memory_space<vmem>>, vector<8x32xf32>
    %c0_1 = arith.constant 0 : index
    %c0_2 = arith.constant 0 : index
    %1 = vector.load %arg1[%c0_1, %c0_2] : memref<8x16xf32, #tpu.memory_space<vmem>>, vector<8x16xf32>
    %2 = arith.truncf %1 : vector<8x16xf32> to vector<8x16xbf16>
    %3 = arith.truncf %0 : vector<8x32xf32> to vector<8x32xbf16>
    %c0_3 = arith.constant 0 : index
    %c0_4 = arith.constant 0 : index
    %4 = vector.load %arg3[%c0_3, %c0_4] : memref<8x32xf32, #tpu.memory_space<vmem>>, vector<8x32xf32>
    %5 = arith.truncf %4 : vector<8x32xf32> to vector<8x32xbf16>
    %6 = tpu.concatenate %2, %3 in 1 : vector<8x16xbf16>, vector<8x32xbf16> -> vector<8x48xbf16>
    %c0_5 = arith.constant 0 : index
    %c0_6 = arith.constant 0 : index
    %7 = vector.load %arg4[%c0_5, %c0_6] : memref<48x64xbf16, #tpu.memory_space<vmem>>, vector<48x64xbf16>
    %cst = arith.constant dense<0.000000e+00> : vector<8x64xf32>
    %8 = tpu.matmul %6, %7, %cst {dimension_numbers = #tpu.dot_dimension_numbers<[1], [0], [0], [1], [0, 0, 1, 1], [], []>} : vector<8x48xbf16>, vector<48x64xbf16>, vector<8x64xf32> -> vector<8x64xf32>
    %c0_7 = arith.constant 0 : index
    %c0_8 = arith.constant 0 : index
    %9 = vector.load %arg7[%c0_7, %c0_8] : memref<1x64xf32, #tpu.memory_space<vmem>>, vector<1x64xf32>
    %10 = vector.broadcast %9 : vector<1x64xf32> to vector<8x64xf32>
    %11 = arith.addf %8, %10 : vector<8x64xf32>
    %12 = math.tanh %11 : vector<8x64xf32>
    %13 = vector.extract_strided_slice %12 {offsets = [0, 0], sizes = [8, 32], strides = [1, 1]} : vector<8x64xf32> to vector<8x32xf32>
    %14 = vector.extract_strided_slice %12 {offsets = [0, 32], sizes = [8, 32], strides = [1, 1]} : vector<8x64xf32> to vector<8x32xf32>
    %15 = tpu.concatenate %2, %5 in 1 : vector<8x16xbf16>, vector<8x32xbf16> -> vector<8x48xbf16>
    %c0_9 = arith.constant 0 : index
    %c0_10 = arith.constant 0 : index
    %16 = vector.load %arg5[%c0_9, %c0_10] : memref<48x32xbf16, #tpu.memory_space<vmem>>, vector<48x32xbf16>
    %cst_11 = arith.constant dense<0.000000e+00> : vector<8x32xf32>
    %17 = tpu.matmul %15, %16, %cst_11 {dimension_numbers = #tpu.dot_dimension_numbers<[1], [0], [0], [1], [0, 0, 1, 1], [], []>} : vector<8x48xbf16>, vector<48x32xbf16>, vector<8x32xf32> -> vector<8x32xf32>
    %c0_12 = arith.constant 0 : index
    %c0_13 = arith.constant 0 : index
    %18 = vector.load %arg8[%c0_12, %c0_13] : memref<1x32xf32, #tpu.memory_space<vmem>>, vector<1x32xf32>
    %19 = vector.broadcast %18 : vector<1x32xf32> to vector<8x32xf32>
    %20 = arith.addf %17, %19 : vector<8x32xf32>
    %21 = math.tanh %20 : vector<8x32xf32>
    %22 = arith.mulf %0, %14 : vector<8x32xf32>
    %23 = arith.truncf %22 : vector<8x32xf32> to vector<8x32xbf16>
    %24 = tpu.concatenate %2, %23 in 1 : vector<8x16xbf16>, vector<8x32xbf16> -> vector<8x48xbf16>
    %c0_14 = arith.constant 0 : index
    %c0_15 = arith.constant 0 : index
    %25 = vector.load %arg6[%c0_14, %c0_15] : memref<48x32xbf16, #tpu.memory_space<vmem>>, vector<48x32xbf16>
    %cst_16 = arith.constant dense<0.000000e+00> : vector<8x32xf32>
    %26 = tpu.matmul %24, %25, %cst_16 {dimension_numbers = #tpu.dot_dimension_numbers<[1], [0], [0], [1], [0, 0, 1, 1], [], []>} : vector<8x48xbf16>, vector<48x32xbf16>, vector<8x32xf32> -> vector<8x32xf32>
    %c0_17 = arith.constant 0 : index
    %c0_18 = arith.constant 0 : index
    %27 = vector.load %arg9[%c0_17, %c0_18] : memref<1x32xf32, #tpu.memory_space<vmem>>, vector<1x32xf32>
    %28 = vector.broadcast %27 : vector<1x32xf32> to vector<8x32xf32>
    %29 = arith.addf %26, %28 : vector<8x32xf32>
    %30 = math.tanh %29 : vector<8x32xf32>
    %cst_19 = arith.constant 1.000000e+00 : f32
    %31 = vector.broadcast %cst_19 : f32 to vector<8x32xf32>
    %32 = arith.subf %31, %21 : vector<8x32xf32>
    %33 = arith.mulf %32, %30 : vector<8x32xf32>
    %34 = arith.mulf %13, %0 : vector<8x32xf32>
    %35 = arith.addf %33, %34 : vector<8x32xf32>
    %c0_20 = arith.constant 0 : index
    %c0_21 = arith.constant 0 : index
    %36 = vector.load %arg10[%c0_20, %c0_21] : memref<8x32xf32, #tpu.memory_space<vmem>>, vector<8x32xf32>
    tpu.vector_store %arg10[%c0_20, %c0_21], %35 {strides = array<i32>} : memref<8x32xf32, #tpu.memory_space<vmem>>, vector<8x32xf32>,
    return
  }
  func.func @transform_0(%arg0: i32) -> (i32, i32) {
    %c0_i32 = arith.constant 0 : i32
    %c0_i32_0 = arith.constant 0 : i32
    return %arg0, %c0_i32 : i32, i32
  }
  func.func @transform_1(%arg0: i32) -> (i32, i32) {
    %c0_i32 = arith.constant 0 : i32
    %c0_i32_0 = arith.constant 0 : i32
    return %arg0, %c0_i32 : i32, i32
  }
  func.func @transform_2(%arg0: i32) -> (i32, i32) {
    %c0_i32 = arith.constant 0 : i32
    %c0_i32_0 = arith.constant 0 : i32
    return %arg0, %c0_i32 : i32, i32
  }
  func.func @transform_3(%arg0: i32) -> (i32, i32) {
    %c0_i32 = arith.constant 0 : i32
    %c0_i32_0 = arith.constant 0 : i32
    %c0_i32_1 = arith.constant 0 : i32
    return %c0_i32, %c0_i32_0 : i32, i32
  }
  func.func @transform_4(%arg0: i32) -> (i32, i32) {
    %c0_i32 = arith.constant 0 : i32
    %c0_i32_0 = arith.constant 0 : i32
    %c0_i32_1 = arith.constant 0 : i32
    return %c0_i32, %c0_i32_0 : i32, i32
  }
  func.func @transform_5(%arg0: i32) -> (i32, i32) {
    %c0_i32 = arith.constant 0 : i32
    %c0_i32_0 = arith.constant 0 : i32
    %c0_i32_1 = arith.constant 0 : i32
    return %c0_i32, %c0_i32_0 : i32, i32
  }
  func.func @transform_6(%arg0: i32) -> (i32, i32) {
    %c0_i32 = arith.constant 0 : i32
    %c0_i32_0 = arith.constant 0 : i32
    %c0_i32_1 = arith.constant 0 : i32
    return %c0_i32, %c0_i32_0 : i32, i32
  }
  func.func @transform_7(%arg0: i32) -> (i32, i32) {
    %c0_i32 = arith.constant 0 : i32
    %c0_i32_0 = arith.constant 0 : i32
    %c0_i32_1 = arith.constant 0 : i32
    return %c0_i32, %c0_i32_0 : i32, i32
  }
  func.func @transform_8(%arg0: i32) -> (i32, i32) {
    %c0_i32 = arith.constant 0 : i32
    %c0_i32_0 = arith.constant 0 : i32
    %c0_i32_1 = arith.constant 0 : i32
    return %c0_i32, %c0_i32_0 : i32, i32
  }
  func.func @transform_9(%arg0: i32) -> (i32, i32) {
    %c0_i32 = arith.constant 0 : i32
    %c0_i32_0 = arith.constant 0 : i32
    return %arg0, %c0_i32 : i32, i32
  }
}

</mosaic_0001>

<bundles_post_ra>
// kernel: tpu_custom_call.1
= control target key start
LH: loop header
LB: loop body
LE: loop exit
PB: predicated region body
PF: predicated region fallthrough
CT: control target
= control target key end

     0   :  { %14 = vsyncpa [#allocation3], 0  ;;  %s1109_s0 = inlined_call_operand.vmem [shape: f32[16,16], index: 0, kind: input, shape index: {}]   ;;  %s1110_s1 = inlined_call_operand.vmem [shape: f32[16,32], index: 1, kind: input, shape index: {}]   ;;  %s1111_s2 = inlined_call_operand.vmem [shape: f32[16,32], index: 2, kind: input, shape index: {}]   ;;  %s1112_s3 = inlined_call_operand.vmem [shape: bf16[48,64], index: 3, kind: input, shape index: {}]   ;;  %s1113_s4 = inlined_call_operand.vmem [shape: bf16[48,32], index: 4, kind: input, shape index: {}]   ;;  %s1114_s5 = inlined_call_operand.vmem [shape: bf16[48,32], index: 5, kind: input, shape index: {}]   ;;  %s1115_s6 = inlined_call_operand.vmem [shape: f32[1,64], index: 6, kind: input, shape index: {}]   ;;  %s1116_s7 = inlined_call_operand.vmem [shape: f32[1,32], index: 7, kind: input, shape index: {}]   ;;  %s1117_s8 = inlined_call_operand.vmem [shape: f32[1,32], index: 8, kind: input, shape index: {}]   ;;  %s1118_s9 = inlined_call_operand.hbm [shape: f32[16,32], index: 9, kind: output, shape index: {}]  }
   0x1   :  { %16 = vsyncpa [#allocation3 + $0x1], 0  ;;  %s962_s30 = smov 0   ;;  %s964_s10 = smov 0  }
   0x2   :  { %s966_s11 = smov 0   ;;  %s968_s12 = smov 0  }
   0x3 LB: > { %s983_s13 = sadd.s32 4294967295, %s905_s12   ;;  %s718_s14 = sadd.s32 4294967294, %s905_s12   ;;  %s905_s12 = sphi %s968_s12, %s1124_s12   ;;  %s901_s11 = sphi %s966_s11, %s1123_s11   ;;  %s897_s10 = sphi %s964_s10, %s1122_s10   ;;  %s893_s30 = sphi %s962_s30, %s1121_s30  }
   0x4   : > { %s987_s15 = sadd.s32 1, %s905_s12   ;;  %s233_s16 = sadd.s32 1, %s901_s11 }
   0x5   : > { %s230_s17 = ssub.s32 %s905_s12, %s987_s15  ;;  %p243_p0 = scmp.ne.s32.totalorder %s901_s11, %s897_s10 }
   0x6   : > { %p231_p1 = scmp.eq.s32.totalorder %s230_s17, 0  ;;  %p244_p2 = scmp.eq.s32.totalorder %s983_s13, 1 }
   0x7   : > { %p249_p3 = scmp.ne.s32.totalorder %s897_s10, %s893_s30  ;;  %p250_p4 = scmp.eq.s32.totalorder %s718_s14, 1 }
   0x8   : > { %s998_s18 = scalar_select %p231_p1, %s901_s11, %s233_s16  }
   0x9   : > { %p1000_p5 = por %p244_p2, %p243_p0  ;;  %p1004_p6 = por %p250_p4, %p249_p3 }
   0xa   : > { %p721_p7 = scmp.ge.s32.totalorder %s905_s12, 1  ;;  %p307_p8 = scmp.lt.s32.totalorder %s905_s12, 3 }
   0xc   : > { %p308_p9 = pnand %p721_p7, %p307_p8 }
   0xd   : > { %p350_p10 = scmp.lt.s32.totalorder (!%p308_p9), %s983_s13, 1  ;;  %s909_s17 = smov (!%p308_p9), 16  }
   0xe   : > { %311 = sbr.rel (%p308_p9) target bundleno = 812 (0x32c), region = 56  ;;  %s910_s16 = smov (!%p308_p9), 96  }
   0xf   : > { %s742_s25 = sshll.u32 (!%p308_p9), %s983_s13, 7 }
  0x13   : > { %v830_v0 = vld [vmem:[%s1112_s3 + $0x10] sm:$0xff]   ;;  %v907_v1 = vmov 0.0   ;;  %s351_s23 = scalar_select %p350_p10, %s983_s13, 1  ;;  %v831_v2 = vld [vmem:[%s1112_s3 + $0x8] sm:$0xff]   ;;  %vm908_vm0 = vmmov 0   ;;  %v832_v4 = vld [vmem:[%s1112_s3] sm:$0xff]  }
  0x14   : > { %757 = vmatprep.subr.bf16.mxu0 %v907_v1  ;;  %767 = vmatprep.subr.bf16.mxu1 %v907_v1  ;;  %vm372_vm1 = vcmask 130048   ;;  %vm407_vm2 = vcmask 392192   ;;  %v726_v12 = vld [vmem:[%s1115_s6] ss:$0 sm:$0xff]  ;;  %v833_v18 = vld [vmem:[%s1113_s4 + $0x10] sm:$0xff]   ;;  %v834_v20 = vld [vmem:[%s1113_s4 + $0x8] sm:$0xff]  }
  0x15   : > { %758 = vmatpush3.bf16.msra.mxu0 %v830_v0  ;;  %s723_s26 = sshll.u32 %s351_s23, 3  ;;  %763 = vmatprep.mubr.msk.bf16.mxu0 %vm908_vm0, %v907_v1  ;;  %v836_v19 = vld [vmem:[%s1114_s5 + $0x10] sm:$0xff]   ;;  %v837_v21 = vld [vmem:[%s1114_s5 + $0x8] sm:$0xff]   ;;  %v835_v22 = vld [vmem:[%s1113_s4] sm:$0xff]   ;;  %vm619_vm3 = vcmask 261120   ;;  %s911_s13 = smov [#allocation2]  }
  0x16   : > { %759 = vmatprep.subr.bf16.mxu0 %v907_v1  ;;  %773 = vmatprep.mubr.msk.bf16.mxu1 %vm908_vm0, %v907_v1  ;;  %s357_s29 = scalar_lea.vmem %s1110_s1, %s723_s26  ;;  %s353_s23 = scalar_lea.vmem %s1109_s0, %s723_s26  ;;  %v838_v24 = vld [vmem:[%s1114_s5] sm:$0xff]  }
  0x17   : > { %v1023_v3 = vld [vmem:[%s357_s29] sm:$0xff]  ;;  %s361_s27 = scalar_lea.vmem %s1111_s2, %s723_s26  ;;  %768 = vmatpush3.bf16.msra.mxu1 %v833_v18  ;;  %s849_s22 = sshll.u32 %s911_s13, 4  ;;  %s850_s22 = int_to_ptr.vmem [resolvable:$false] %s849_s22 }
  0x18   : > { %v366_v5 = vpack.c.bf16 %v1023_v3, %v1023_v3  ;;  %v364_v6 = vld [vmem:[%s353_s23] sm:$0xff]  ;;  %769 = vmatprep.subr.bf16.mxu1 %v907_v1  ;;  %s851_s23 = scalar_lea.vmem %s850_s22, 256 }
  0x19   : > { %760 = vmatpush3.bf16.msra.mxu0 %v831_v2  ;;  %v365_v7 = vpack.c.bf16 %v364_v6, %v364_v6  ;;  %v367_v10 = vld [vmem:[%s361_s27] sm:$0xff] }
  0x1a   : > { %761 = vmatprep.subr.bf16.mxu0 %v907_v1  ;;  %370 = vrot.lane.b32.xlu0 %v366_v5, %s909_s17  ;;  %v368_v11 = vpack.c.bf16 %v367_v10, %v367_v10  ;;  %v731_v36 = vld [vmem:[%s1116_s7] ss:$0 sm:$0xff] }
  0x1b   : > { %770 = vmatpush3.bf16.msra.mxu1 %v834_v20  ;;  %v736_v38 = vld [vmem:[%s1117_s8] ss:$0 sm:$0xff] }
  0x1c   : > { %452 = vrot.lane.b32.xlu1 %v368_v11, %s909_s17  ;;  %771 = vmatprep.subr.bf16.mxu1 %v907_v1 }
  0x1d   : > { %762 = vmatpush3.bf16.msra.mxu0 %v832_v4 }
  0x1e   : > { %777 = vmatprep.subr.bf16.mxu0 %v907_v1 }
  0x1f   : > { %772 = vmatpush3.bf16.msra.mxu1 %v835_v22 }
  0x8c   : > { %v371_v8 = vpop.permute.xlu0 %370 }
  0x8d   : > { %v375_v9 = vsel %vm372_vm1, %v365_v7, %v371_v8 }
  0x8e   : > { %764 = vmatmul.mubr.msk.bf16.vlgmr.msra.gmra.mxu0 %vm407_vm2, %v375_v9  ;;  %v453_v23 = vpop.permute.xlu1 %452 }
  0x8f   : > { %783 = vmatprep.mubr.msk.bf16.mxu0 %vm908_vm0, %v907_v1  ;;  %778 = vmatpush3.bf16.msra.mxu0 %v836_v19  ;;  %v455_v26 = vsel %vm372_vm1, %v365_v7, %v453_v23 }
  0x90   : > { %779 = vmatprep.subr.bf16.mxu0 %v907_v1  ;;  %774 = vmatmul.mubr.msk.bf16.vlgmr.msra.gmra.mxu1 %vm407_vm2, %v455_v26 }
  0x93   : > { %780 = vmatpush3.bf16.msra.mxu0 %v837_v21 }
  0x94   : > { %781 = vmatprep.subr.bf16.mxu0 %v907_v1 }
  0x97   : > { %782 = vmatpush3.bf16.msra.mxu0 %v838_v24 }
 0x14e   : > { %v444_v13 = vpop.f32.mrf.mxu0 }
 0x14f   : > { %v445_v14 = vadd.f32 %v726_v12, %v444_v13 }
 0x150   : > { %v765_v15 = vpop.f32.mrf.mxu0  ;;  %v523_v30 = vpop.f32.mrf.mxu1 }
 0x151   : > { %839 = vtanh.f32 %v445_v14  ;;  %v524_v37 = vadd.f32 %v731_v36, %v523_v30 }
 0x152   : > { %v447_v16 = vpop.f32.mrf.mxu0  ;;  %v775_v31 = vpop.f32.mrf.mxu1 }
 0x153   : > { %841 = vtanh.f32 %v524_v37 }
 0x154   : > { %v766_v17 = vpop.f32.mrf.mxu0  ;;  %v526_v32 = vpop.f32.mrf.mxu1 }
 0x156   : > { %v776_v33 = vpop.f32.mrf.mxu1 }
 0x15e   : > { %v840_v25 = vpop.eup %839 }
 0x15f   : > { %531 = vrot.lane.b32.xlu0 %v840_v25, %s910_s16  ;;  %v617_v48 = vmul.f32 %v840_v25, %v1023_v3  ;;  %s633_s16 = scalar_lea.hbm %s1118_s9, %s742_s25 }
 0x160   : > { %v842_v44 = vpop.eup %841 }
 0x161   : > { %v615_v45 = vsub.f32 1.0, %v842_v44 }
 0x1d1   : > { %v532_v27 = vpop.permute.xlu0 %531 }
 0x1d2   : > { %v534_v28 = vmul.f32 %v532_v27, %v1023_v3 }
 0x1d4   : > { %v535_v29 = vpack.c.bf16 %v534_v28, %v534_v28 }
 0x1d6   : > { %537 = vrot.lane.b32.xlu1 %v535_v29, %s909_s17  ;;  %s347_s17 = sand.u32 1, %s897_s10  }
 0x1d7   : > { %s722_s24 = sshll.u32 %s347_s17, 3  ;;  %s622_s21 = scalar_lea.sflag [#allocation3], %s347_s17 }
 0x1d8   : > { %s349_s27 = scalar_lea.vmem [#allocation2], %s722_s24 }
 0x1d9   : > { %s635_s28 = sshll.u32 %s349_s27, 4  ;;  %s636_s28 = int_to_ptr.vmem [resolvable:$true] %s635_s28 }
 0x1da   : > { %s845_s26 = scalar_lea.vmem %s636_s28, 128  ;;  %p852_p0 = scmp.lt.s32.totalorder %s636_s28, %s850_s22 }
 0x1db   : > { %p846_p11 = scmp.ne.s32.totalorder %s636_s28, %s845_s26  ;;  %p853_p1 = scmp.lt.s32.totalorder %s851_s23, %s845_s26 }
 0x1dd   : > { %p847_p12 = pnand %p846_p11, %p1000_p5  ;;  %p854_p2 = por %p853_p1, %p852_p0 }
 0x1df   : > { %p848_p13 = pneg %p847_p12 }
 0x1e1   : > { %p855_p3 = pnand %p854_p2, %p848_p13 }
 0x248   : > { %v538_v34 = vpop.permute.xlu1 %537 }
 0x249   : > { %v540_v35 = vsel %vm372_vm1, %v365_v7, %v538_v34 }
 0x24a   : > { %784 = vmatmul.mubr.msk.bf16.vlgmr.msra.gmra.mxu0 %vm407_vm2, %v540_v35 }
 0x30a   : > { %v608_v39 = vpop.f32.mrf.mxu0 }
 0x30b   : > { %v609_v40 = vadd.f32 %v736_v38, %v608_v39 }
 0x30c   : > { %v785_v41 = vpop.f32.mrf.mxu0 }
 0x30d   : > { %843 = vtanh.f32 %v609_v40 }
 0x30e   : > { %v611_v42 = vpop.f32.mrf.mxu0 }
 0x310   : > { %v786_v43 = vpop.f32.mrf.mxu0 }
 0x31a   : > { %v844_v46 = vpop.eup %843 }
 0x31b   : > { %v616_v47 = vmul.f32 %v844_v46, %v615_v45 }
 0x31d   : > { %v618_v49 = vadd.f32 %v617_v48, %v616_v47 }
 0x31f   : > { %620 = vst.msk [vmem:[%s349_s27] sm:$0xff] %vm619_vm3, %v618_v49 }
 0x320   : > { %858 = shalt.err (!%p855_p3)
}
 0x321   : > { %s859_s24 = scalar_lea.hbm %s633_s16, 128  ;;  %s863_s27 = scalar_lea.hbm %s1118_s9, 256 }
 0x322   : > { %p860_p4 = scmp.ne.s32.totalorder %s633_s16, %s859_s24  ;;  %p864_p9 = scmp.lt.s32.totalorder %s633_s16, %s1118_s9 }
 0x323   : > { %p865_p10 = scmp.lt.s32.totalorder %s863_s27, %s859_s24 }
 0x324   : > { %p861_p7 = pnand %p860_p4, %p1000_p5 }
 0x325   : > { %p866_p11 = por %p865_p10, %p864_p9 }
 0x326   : > { %p862_p8 = pneg %p861_p7 }
 0x328   : > { %p867_p12 = pnand %p866_p11, %p862_p8 }
 0x32a   : > { %870 = shalt.err (!%p867_p12)
}
 0x32b   : > { %787 = dma.vmem_to_hbm [thread:$0]  (%p1000_p5), %s636_s28, 128, %s633_s16, %s622_s21  }
 0x32c PF: > { %p793_p13 = scmp.ge.s32.totalorder %s905_s12, 2  ;;  %s647_s26 = sand.u32 1, %s893_s30  }
 0x32d   : > { %s648_s13 = scalar_lea.sflag [#allocation3], %s647_s26 }
 0x32e   : > { %p790_p0 = pnand %p793_p13, %p1004_p6 }
 0x330   : > { %p791_p1 = pneg %p790_p0 }
 0x332   : > { %888 = dma.done.wait (%p791_p1), %s648_s13, 128  }
 0x333   : > { %890 = vsyncadd (%p791_p1), %s648_s13, 4294967168  ;;  %p19_p2 = scmp.ge.s32.totalorder %s987_s15, 4   ;;  %s1121_s30 = smov %s897_s10 }
 0x334   : > { %s1122_s10 = smov %s901_s11  ;;  %s1123_s11 = smov %s998_s18 }
 0x335   : > { %s1124_s12 = smov %s987_s15  ;;  %21 = sbr.rel (!%p19_p2) target bundleno = 3 (0x3), region = 97 }
 0x33a   :  { %653 = vsyncpa [#allocation3], 1 }
 0x33b   :  { %655 = vsyncpa [#allocation3 + $0x1], 1 }

</bundles_post_ra>
